<compile_context>
chip_gen: v7x
topology: tpu7x:2x2x1
jax: 0.10.0
libtpu: 0.0.40
codegen_flags: <defaults>
</compile_context>

<pallas_src>
import functools
import math

import jax
import jax.numpy as jnp
from jax.experimental import pallas as pl
from jax.experimental.pallas import tpu as pltpu


# ------------------------------ small helpers ------------------------------ #

def _row_block(m, cap=256):
    """Largest divisor of m that is <= cap (block rows for M-tiled kernels)."""
    if m <= cap:
        return m
    for b in range(cap, 0, -1):
        if m % b == 0:
            return b
    return m


def _gelu_tanh(x):
    # TODO(synk): torch nn.GELU default is erf-exact; tanh approximation used here
    # for robust Mosaic lowering (~1e-3 deviation).
    c = math.sqrt(2.0 / math.pi)
    return 0.5 * x * (1.0 + jnp.tanh(c * (x + 0.044715 * x * x * x)))


# ----------------------------- Pallas kernels ------------------------------ #

def _linear_kernel(x_ref, w_ref, b_ref, o_ref):
    x = x_ref[...].astype(jnp.bfloat16)
    w = w_ref[...].astype(jnp.bfloat16)
    y = jnp.dot(x, w, preferred_element_type=jnp.float32) + b_ref[...]
    o_ref[...] = y.astype(o_ref.dtype)


def pallas_linear(x, w, b):
    """Row-tiled x @ w + b; bf16 MXU operands, f32 accumulation."""
    M, K = x.shape
    N = w.shape[1]
    tm = _row_block(M)
    return pl.pallas_call(
        _linear_kernel,
        out_shape=jax.ShapeDtypeStruct((M, N), jnp.float32),
        grid=(M // tm,),
        in_specs=[
            pl.BlockSpec((tm, K), lambda i: (i, 0)),
            pl.BlockSpec((K, N), lambda i: (0, 0)),
            pl.BlockSpec((1, N), lambda i: (0, 0)),
        ],
        out_specs=pl.BlockSpec((tm, N), lambda i: (i, 0)),
        compiler_params=pltpu.CompilerParams(dimension_semantics=("parallel",)),
    )(x, w, b.reshape(1, N))


def _proj_add_ln_kernel(x_ref, w_ref, b_ref, r_ref, g_ref, be_ref, o_ref, *, eps):
    # out = LayerNorm(residual + x @ w + b)
    x = x_ref[...].astype(jnp.bfloat16)
    w = w_ref[...].astype(jnp.bfloat16)
    h = jnp.dot(x, w, preferred_element_type=jnp.float32) + b_ref[...]
    h = h + r_ref[...].astype(jnp.float32)
    mu = jnp.mean(h, axis=-1, keepdims=True)
    var = jnp.mean(jnp.square(h - mu), axis=-1, keepdims=True)
    y = (h - mu) * jax.lax.rsqrt(var + eps)
    o_ref[...] = (y * g_ref[...] + be_ref[...]).astype(o_ref.dtype)


def pallas_proj_add_ln(x, w, b, res, gamma, beta, eps=1e-5):
    M, D = x.shape
    tm = _row_block(M)
    return pl.pallas_call(
        functools.partial(_proj_add_ln_kernel, eps=eps),
        out_shape=jax.ShapeDtypeStruct((M, D), jnp.float32),
        grid=(M // tm,),
        in_specs=[
            pl.BlockSpec((tm, D), lambda i: (i, 0)),
            pl.BlockSpec((D, D), lambda i: (0, 0)),
            pl.BlockSpec((1, D), lambda i: (0, 0)),
            pl.BlockSpec((tm, D), lambda i: (i, 0)),
            pl.BlockSpec((1, D), lambda i: (0, 0)),
            pl.BlockSpec((1, D), lambda i: (0, 0)),
        ],
        out_specs=pl.BlockSpec((tm, D), lambda i: (i, 0)),
        compiler_params=pltpu.CompilerParams(dimension_semantics=("parallel",)),
    )(x, w, b.reshape(1, D), res, gamma.reshape(1, D), beta.reshape(1, D))


def _ffn_add_ln_kernel(x_ref, w1_ref, b1_ref, w2_ref, b2_ref, g_ref, be_ref, o_ref,
                       *, eps):
    # out = LayerNorm(x + gelu(x @ w1 + b1) @ w2 + b2) -- no (M, F) HBM round trip.
    x = x_ref[...]
    h1 = jnp.dot(x.astype(jnp.bfloat16), w1_ref[...].astype(jnp.bfloat16),
                 preferred_element_type=jnp.float32) + b1_ref[...]
    h1 = _gelu_tanh(h1)
    h2 = jnp.dot(h1.astype(jnp.bfloat16), w2_ref[...].astype(jnp.bfloat16),
                 preferred_element_type=jnp.float32) + b2_ref[...]
    h = h2 + x.astype(jnp.float32)
    mu = jnp.mean(h, axis=-1, keepdims=True)
    var = jnp.mean(jnp.square(h - mu), axis=-1, keepdims=True)
    y = (h - mu) * jax.lax.rsqrt(var + eps)
    o_ref[...] = (y * g_ref[...] + be_ref[...]).astype(o_ref.dtype)


def pallas_ffn_add_ln(x, w1, b1, w2, b2, gamma, beta, eps=1e-5):
    M, D = x.shape
    F = w1.shape[1]
    tm = _row_block(M)
    return pl.pallas_call(
        functools.partial(_ffn_add_ln_kernel, eps=eps),
        out_shape=jax.ShapeDtypeStruct((M, D), jnp.float32),
        grid=(M // tm,),
        in_specs=[
            pl.BlockSpec((tm, D), lambda i: (i, 0)),
            pl.BlockSpec((D, F), lambda i: (0, 0)),
            pl.BlockSpec((1, F), lambda i: (0, 0)),
            pl.BlockSpec((F, D), lambda i: (0, 0)),
            pl.BlockSpec((1, D), lambda i: (0, 0)),
            pl.BlockSpec((1, D), lambda i: (0, 0)),
            pl.BlockSpec((1, D), lambda i: (0, 0)),
        ],
        out_specs=pl.BlockSpec((tm, D), lambda i: (i, 0)),
        compiler_params=pltpu.CompilerParams(dimension_semantics=("parallel",)),
    )(x, w1, b1.reshape(1, F), w2, b2.reshape(1, D),
      gamma.reshape(1, D), beta.reshape(1, D))


def _head_bmm_kernel(x_ref, m_ref, o_ref, *, scale):
    # (L, d) @ (d, 2k) per (batch, head); positional matrix reused across batch.
    x = x_ref[0, 0].astype(jnp.bfloat16)
    m = m_ref[0].astype(jnp.bfloat16)
    y = jnp.dot(x, m, preferred_element_type=jnp.float32) * scale
    o_ref[0, 0] = y.astype(o_ref.dtype)


def pallas_head_bmm(x, mat, scale):
    """x: (B, Hn, L, d); mat: (Hn, d, K2) shared across batch -> (B, Hn, L, K2)."""
    B, Hn, L, d = x.shape
    K2 = mat.shape[-1]
    return pl.pallas_call(
        functools.partial(_head_bmm_kernel, scale=scale),
        out_shape=jax.ShapeDtypeStruct((B, Hn, L, K2), jnp.float32),
        grid=(B, Hn),
        in_specs=[
            pl.BlockSpec((1, 1, L, d), lambda b, h: (b, h, 0, 0)),
            pl.BlockSpec((1, d, K2), lambda b, h: (h, 0, 0)),   # no jnp.tile over batch
        ],
        out_specs=pl.BlockSpec((1, 1, L, K2), lambda b, h: (b, h, 0, 0)),
        compiler_params=pltpu.CompilerParams(
            dimension_semantics=("parallel", "parallel")),
    )(x, mat)


def _attn_kernel(q_ref, k_ref, v_ref, rel_ref, mask_ref, o_ref, *, inv_scale):
    q = q_ref[0, 0].astype(jnp.bfloat16)     # (L, d)
    k = k_ref[0, 0].astype(jnp.bfloat16)
    v = v_ref[0, 0].astype(jnp.bfloat16)
    s = jax.lax.dot_general(q, k, (((1,), (1,)), ((), ())),
                            preferred_element_type=jnp.float32) * inv_scale
    s = s + rel_ref[0, 0] + mask_ref[0, 0]
    s = jnp.maximum(s, jnp.float32(-1e30))   # guard fully-masked rows (no -inf/NaN)
    m = jnp.max(s, axis=-1, keepdims=True)
    p = jnp.exp(s - m)
    denom = jnp.sum(p, axis=-1, keepdims=True)
    p = p * pl.reciprocal(denom, approx=True)
    o_ref[0, 0] = jnp.dot(p.astype(jnp.bfloat16), v,
                          preferred_element_type=jnp.float32).astype(o_ref.dtype)


def pallas_attention(q, k, v, rel_att, attn_mask, inv_scale):
    """softmax(q @ k^T * inv_scale + rel_att + mask) @ v per (batch, head)."""
    # TODO(synk): for long sequences, tile the KV axis with an online softmax
    # (flash-style m/l/acc scratch) instead of the full (L, L) score tile.
    B, Hn, L, d = q.shape
    return pl.pallas_call(
        functools.partial(_attn_kernel, inv_scale=inv_scale),
        out_shape=jax.ShapeDtypeStruct((B, Hn, L, d), jnp.float32),
        grid=(B, Hn),
        in_specs=[
            pl.BlockSpec((1, 1, L, d), lambda b, h: (b, h, 0, 0)),
            pl.BlockSpec((1, 1, L, d), lambda b, h: (b, h, 0, 0)),
            pl.BlockSpec((1, 1, L, d), lambda b, h: (b, h, 0, 0)),
            pl.BlockSpec((1, 1, L, L), lambda b, h: (b, h, 0, 0)),
            pl.BlockSpec((1, 1, L, L), lambda b, h: (b, 0, 0, 0)),  # mask reused over heads
        ],
        out_specs=pl.BlockSpec((1, 1, L, d), lambda b, h: (b, h, 0, 0)),
        compiler_params=pltpu.CompilerParams(
            dimension_semantics=("parallel", "parallel")),
    )(q, k, v, rel_att, attn_mask)


# ------------------------------ JAX glue ----------------------------------- #

def build_relative_position(q_size, k_size):
    q_ids = jnp.arange(q_size, dtype=jnp.int32)
    k_ids = jnp.arange(k_size, dtype=jnp.int32)
    return (q_ids[:, None] - k_ids[None, :])[None]  # (1, Lq, Lk)


def _expand_mask(mask, dtype, tgt_len):
    bsz, src_len = mask.shape
    expanded = jnp.broadcast_to(
        mask[:, None, None, :].astype(dtype), (bsz, 1, tgt_len, src_len))
    inverted = 1.0 - expanded
    return jnp.where(inverted > 0, jnp.finfo(dtype).min, jnp.zeros_like(inverted))


def deberta_emd_forward(params, i_state, h, mask, relative_pos, rel_embedding,
                        num_heads, max_rel, group_repeat, ln_eps=1e-5):
    B, L, D = h.shape
    Hn = num_heads
    d = D // Hn
    M = B * L
    inv_scale = 1.0 / math.sqrt(d * 3.0)   # scale_factor = 1 + len(["c2p", "p2c"])

    # -------- loop-invariant scaffolding (hoisted out of all loops) --------
    attn_mask = _expand_mask(mask, h.dtype, L) if mask.ndim != 4 else mask  # (B,1,L,L)
    if relative_pos is None:
        relative_pos = build_relative_position(L, L)
    att_span = min(L, max_rel)
    k2 = 2 * att_span
    rel = relative_pos.reshape(L, L)                                  # rel[i, j] = i - j
    c2p_idx_b = jnp.broadcast_to(
        jnp.clip(rel + att_span, 0, k2 - 1)[None, None], (B, Hn, L, L))
    p2c_idx_b = jnp.broadcast_to(
        jnp.clip(-rel + att_span, 0, k2 - 1)[None, None], (B, Hn, L, L))
    rel_emb = jax.lax.dynamic_slice_in_dim(
        rel_embedding, max_rel - att_span, k2, axis=0)                # (2k, D)

    h2 = h.reshape(M, D)

    def to_heads(x):           # (M, D) -> (B, Hn, L, d)
        return x.reshape(B, L, Hn, d).transpose(0, 2, 1, 3)

    def head_mat(x):           # (2k, D) -> (Hn, d, 2k)
        return x.reshape(k2, Hn, d).transpose(1, 2, 0)

    for bp in params["blocks"]:
        # ---- per-block precompute, hoisted out of the group_repeat loop ----
        # K/V fused into one matmul over h (constant across repeats).
        w_kv = jnp.concatenate([bp["wk"], bp["wv"]], axis=1)
        b_kv = jnp.concatenate([bp["bk"], bp["bv"]], axis=0)
        kv = pallas_linear(h2, w_kv, b_kv)                            # (M, 2D)
        kh = to_heads(kv[:, :D])
        vh = to_heads(kv[:, D:])

        # Positional key/query projections fused into one matmul (pos_key has no bias).
        w_pos = jnp.concatenate([bp["w_pos_k"], bp["w_pos_q"]], axis=1)
        b_pos = jnp.concatenate([bp["b_pos_k"], bp["b_pos_q"]], axis=0)
        pos = pallas_linear(rel_emb, w_pos, b_pos)                    # (2k, 2D)
        pos_key_h = head_mat(pos[:, :D])                              # (Hn, d, 2k)
        pos_query_h = head_mat(pos[:, D:])

        # p2c bias depends only on h -> hoisted out of the repeat loop.
        p2c_att = pallas_head_bmm(kh, pos_query_h, inv_scale)         # (B, Hn, L, 2k)
        # TODO(synk): relative-position bucket gather kept in XLA glue
        # (take_along_axis); moving it in-kernel needs a Mosaic lane-gather.
        p2c_bias_t = jnp.swapaxes(
            jnp.take_along_axis(p2c_att, p2c_idx_b, axis=-1), -1, -2)  # (B, Hn, L, L)

        for _ in range(group_repeat):
            q2 = i_state.reshape(M, D)
            qh = to_heads(pallas_linear(q2, bp["wq"], bp["bq"]))
            c2p_att = pallas_head_bmm(qh, pos_key_h, inv_scale)        # (B, Hn, L, 2k)
            rel_att = jnp.take_along_axis(c2p_att, c2p_idx_b, axis=-1) + p2c_bias_t

            ctx = pallas_attention(qh, kh, vh, rel_att, attn_mask, inv_scale)
            attn_out = ctx.transpose(0, 2, 1, 3).reshape(M, D)

            # dropout1/dropout2: identity at inference
            x = pallas_proj_add_ln(attn_out, bp["wo"], bp["bo"], q2,
                                   bp["ln1_g"], bp["ln1_b"], ln_eps)
            y = pallas_ffn_add_ln(x, bp["w_fc1"], bp["b_fc1"],
                                  bp["w_fc2"], bp["b_fc2"],
                                  bp["ln2_g"], bp["ln2_b"], ln_eps)
            i_state = y.reshape(B, L, D)
    return i_state
    # TODO(synk): MoE pwff branch and obey_other_attn_output structured outputs are
    # config-gated off by default and not modeled here.


# --------------------------- deterministic params -------------------------- #

def init_block_params(key, D, F):
    layout = [
        ("wq", D, D, True), ("wk", D, D, True), ("wv", D, D, True),
        ("w_pos_k", D, D, False), ("w_pos_q", D, D, True),
        ("wo", D, D, True),
        ("w_fc1", D, F, True), ("w_fc2", F, D, True),
    ]
    p = {}
    keys = jax.random.split(key, len(layout))
    for kk, (name, fi, fo, has_b) in zip(keys, layout):
        kw, kb = jax.random.split(kk)
        p[name] = 0.05 * jax.random.normal(kw, (fi, fo), jnp.float32)
        bname = "b" + name[1:]
        p[bname] = (0.05 * jax.random.normal(kb, (fo,), jnp.float32)
                    if has_b else jnp.zeros((fo,), jnp.float32))
    p["ln1_g"] = jnp.ones((D,), jnp.float32)
    p["ln1_b"] = jnp.zeros((D,), jnp.float32)
    p["ln2_g"] = jnp.ones((D,), jnp.float32)
    p["ln2_b"] = jnp.zeros((D,), jnp.float32)
    return p


# ---------------------------------- main ----------------------------------- #

if __name__ == "__main__":
    B, L, D, Hn, F = 2, 8, 32, 4, 64
    max_rel = 8
    num_emd_groups, group_repeat = 1, 2

    root = jax.random.PRNGKey(0)
    k_h, k_i, k_rel, k_par = jax.random.split(root, 4)

    h = jax.random.normal(k_h, (B, L, D), jnp.float32)        # encoder output
    i0 = jax.random.normal(k_i, (B, L, D), jnp.float32)       # EMD query state
    mask = jnp.ones((B, L), jnp.float32).at[1, -2:].set(0.0)  # some padding
    relative_pos = build_relative_position(L, L)              # (1, L, L) int32
    rel_embedding = 0.05 * jax.random.normal(k_rel, (2 * max_rel, D), jnp.float32)

    params = {
        "blocks": [init_block_params(jax.random.fold_in(k_par, g), D, F)
                   for g in range(num_emd_groups)]
    }

    out = deberta_emd_forward(params, i0, h, mask, relative_pos, rel_embedding,
                              Hn, max_rel, group_repeat)
    out = jax.block_until_ready(out)
    assert out.shape == (B, L, D)
    assert bool(jnp.all(jnp.isfinite(out)))
    print("KERNEL_OK")
</pallas_src>

<mosaic_0001>
module attributes {stable_mosaic.version = 11 : i64} {
  func.func @_linear_kernel(%arg0: i32, %arg1: memref<16x32xf32, #tpu.memory_space<vmem>>, %arg2: memref<32x64xf32, #tpu.memory_space<vmem>>, %arg3: memref<1x64xf32, #tpu.memory_space<vmem>>, %arg4: memref<16x64xf32, #tpu.memory_space<vmem>>) attributes {dimension_semantics = [#tpu.dimension_semantics<parallel>], iteration_bounds = array<i64: 1>, scalar_prefetch = 0 : i64, scratch_operands = 0 : i64, tpu.core_type = #tpu.core_type<tc>, window_params = [{transform_indices = @transform_0, window_bounds = array<i64: 16, 32>}, {pipeline_mode = #tpu.pipeline_mode<synchronous>, transform_indices = @transform_1, window_bounds = array<i64: 32, 64>}, {pipeline_mode = #tpu.pipeline_mode<synchronous>, transform_indices = @transform_2, window_bounds = array<i64: 1, 64>}, {transform_indices = @transform_3, window_bounds = array<i64: 16, 64>}]} {
    %c0 = arith.constant 0 : index
    %c0_0 = arith.constant 0 : index
    %0 = vector.load %arg1[%c0, %c0_0] : memref<16x32xf32, #tpu.memory_space<vmem>>, vector<16x32xf32>
    %1 = arith.truncf %0 : vector<16x32xf32> to vector<16x32xbf16>
    %c0_1 = arith.constant 0 : index
    %c0_2 = arith.constant 0 : index
    %2 = vector.load %arg2[%c0_1, %c0_2] : memref<32x64xf32, #tpu.memory_space<vmem>>, vector<32x64xf32>
    %3 = arith.truncf %2 : vector<32x64xf32> to vector<32x64xbf16>
    %cst = arith.constant dense<0.000000e+00> : vector<16x64xf32>
    %4 = tpu.matmul %1, %3, %cst {dimension_numbers = #tpu.dot_dimension_numbers<[1], [0], [0], [1], [0, 0, 1, 1], [], []>} : vector<16x32xbf16>, vector<32x64xbf16>, vector<16x64xf32> -> vector<16x64xf32>
    %c0_3 = arith.constant 0 : index
    %c0_4 = arith.constant 0 : index
    %5 = vector.load %arg3[%c0_3, %c0_4] : memref<1x64xf32, #tpu.memory_space<vmem>>, vector<1x64xf32>
    %6 = vector.broadcast %5 : vector<1x64xf32> to vector<16x64xf32>
    %7 = arith.addf %4, %6 : vector<16x64xf32>
    %c0_5 = arith.constant 0 : index
    %c0_6 = arith.constant 0 : index
    %8 = vector.load %arg4[%c0_5, %c0_6] : memref<16x64xf32, #tpu.memory_space<vmem>>, vector<16x64xf32>
    tpu.vector_store %arg4[%c0_5, %c0_6], %7 {strides = array<i32>} : memref<16x64xf32, #tpu.memory_space<vmem>>, vector<16x64xf32>,
    return
  }
  func.func @transform_0(%arg0: i32) -> (i32, i32) {
    %c0_i32 = arith.constant 0 : i32
    %c0_i32_0 = arith.constant 0 : i32
    return %arg0, %c0_i32 : i32, i32
  }
  func.func @transform_1(%arg0: i32) -> (i32, i32) {
    %c0_i32 = arith.constant 0 : i32
    %c0_i32_0 = arith.constant 0 : i32
    %c0_i32_1 = arith.constant 0 : i32
    return %c0_i32, %c0_i32_0 : i32, i32
  }
  func.func @transform_2(%arg0: i32) -> (i32, i32) {
    %c0_i32 = arith.constant 0 : i32
    %c0_i32_0 = arith.constant 0 : i32
    %c0_i32_1 = arith.constant 0 : i32
    return %c0_i32, %c0_i32_0 : i32, i32
  }
  func.func @transform_3(%arg0: i32) -> (i32, i32) {
    %c0_i32 = arith.constant 0 : i32
    %c0_i32_0 = arith.constant 0 : i32
    return %arg0, %c0_i32 : i32, i32
  }
}

</mosaic_0001>

<bundles_post_ra>
// kernel: tpu_custom_call.1
= control target key start
LH: loop header
LB: loop body
LE: loop exit
PB: predicated region body
PF: predicated region fallthrough
CT: control target
= control target key end

     0   :  { %8 = vsyncpa [#allocation3], 0  ;;  %s293_s0 = inlined_call_operand.hbm [shape: f32[16,32], index: 0, kind: input, shape index: {}]   ;;  %s294_s1 = inlined_call_operand.hbm [shape: f32[32,64], index: 1, kind: input, shape index: {}]   ;;  %s295_s2 = inlined_call_operand.vmem [shape: f32[1,64], index: 2, kind: input, shape index: {}]   ;;  %s296_s3 = inlined_call_operand.hbm [shape: f32[16,64], index: 3, kind: output, shape index: {}]  }
   0x1   :  { %9 = vsyncpa [#allocation6], 0 }
   0x2   :  { %10 = vsyncpa [#allocation4], 0  ;;  %s218_s12 = smov [#allocation2]   ;;  %s146_s16 = scalar_lea.hbm %s293_s0, 256 }
   0x3   :  { %s16_s13 = sshll.u32 %s218_s12, 4  ;;  %p147_p0 = scmp.ne.s32.totalorder %s293_s0, %s146_s16  ;;  %s17_s13 = int_to_ptr.vmem [resolvable:$true] %s16_s13 }
   0x4   :  { %p150_p1 = scmp.lt.u32.totalorder %s146_s16, %s293_s0 }
   0x6   :  { %p152_p2 = pnand %p150_p1, %p147_p0 }
   0x8   :  { %155 = shalt.err (!%p152_p2)
}
   0x9   :  { %s156_s21 = scalar_lea.vmem %s17_s13, 256  ;;  %p161_p4 = scmp.lt.s32.totalorder %s17_s13, %s17_s13 }
   0xa   :  { %p157_p3 = scmp.ne.s32.totalorder %s17_s13, %s156_s21  ;;  %p162_p5 = scmp.lt.s32.totalorder %s156_s21, %s156_s21 }
   0xc   :  { %p163_p6 = por %p162_p5, %p161_p4 }
   0xe   :  { %p164_p7 = pnand %p163_p6, %p157_p3 }
  0x10   :  { %167 = shalt.err (!%p164_p7)
}
  0x11   :  { %s219_s22 = smov 128   ;;  %s220_s23 = smov 8  }
  0x12   :  { %22 = dma.hbm_to_vmem [thread:$0]  %s293_s0, 256, %s17_s13, [#allocation3], %s219_s22, %s219_s22, %s220_s23  }
  0x13   :  { %s221_s26 = smov [#allocation5]   ;;  %s168_s30 = scalar_lea.hbm %s294_s1, 512 }
  0x14   :  { %s28_s27 = sshll.u32 %s221_s26, 4  ;;  %p169_p8 = scmp.ne.s32.totalorder %s294_s1, %s168_s30  ;;  %s29_s27 = int_to_ptr.vmem [resolvable:$true] %s28_s27 }
  0x15   :  { %p172_p9 = scmp.lt.u32.totalorder %s168_s30, %s294_s1 }
  0x17   :  { %p174_p10 = pnand %p172_p9, %p169_p8 }
  0x19   :  { %177 = shalt.err (!%p174_p10)
}
  0x1a   :  { %s178_s8 = scalar_lea.vmem %s29_s27, 512  ;;  %p183_p12 = scmp.lt.s32.totalorder %s29_s27, %s29_s27 }
  0x1b   :  { %p179_p11 = scmp.ne.s32.totalorder %s29_s27, %s178_s8  ;;  %p184_p13 = scmp.lt.s32.totalorder %s178_s8, %s178_s8 }
  0x1d   :  { %p185_p0 = por %p184_p13, %p183_p12 }
  0x1f   :  { %p186_p1 = pnand %p185_p0, %p179_p11 }
  0x21   :  { %189 = shalt.err (!%p186_p1)
}
  0x22   :  { %34 = dma.hbm_to_vmem [thread:$0]  %s294_s1, 512, %s29_s27, [#allocation6], %s219_s22, %s219_s22, %s220_s23  }
  0x23   :  { %212 = dma.done.wait [#allocation3], 256  }
  0x24   :  { %213 = vsyncadd [#allocation3], 4294967040 }
  0x25   :  { %214 = dma.done.wait [#allocation6], 512  }
  0x26   :  { %215 = vsyncadd [#allocation6], 4294966784  ;;  %v222_v0 = vmov 0.0   ;;  %vm223_vm0 = vmmov 0   ;;  %v47_v1 = vld [vmem:[#allocation5] sm:$0xff]  ;;  %v48_v2 = vld [vmem:[#allocation5 + $0x8] sm:$0xff] }
  0x27   :  { %131 = vmatprep.subr.bf16.mxu0 %v222_v0  ;;  %135 = vmatprep.mubr.msk.bf16.mxu0 %vm223_vm0, %v222_v0  ;;  %v49_v3 = vld [vmem:[#allocation5 + $0x10] sm:$0xff]  ;;  %v51_v4 = vpack.c.bf16 %v48_v2, %v47_v1  ;;  %v50_v5 = vld [vmem:[#allocation5 + $0x18] sm:$0xff]  ;;  %vm60_vm1 = vcmask 261120   ;;  %vm105_vm2 = vcmask 523264   ;;  %s224_s11 = smov [#allocation7]  }
  0x28   :  { %v52_v6 = vpack.c.bf16 %v50_v5, %v49_v3  ;;  %v44_v7 = vld [vmem:[#allocation2] sm:$0xff]  ;;  %v45_v8 = vld [vmem:[#allocation2 + $0x8] sm:$0xff]  ;;  %s113_s12 = sshll.u32 %s224_s11, 4  ;;  %s114_s12 = int_to_ptr.vmem [resolvable:$true] %s113_s12 }
  0x29   :  { %132 = vmatpush3.bf16.msra.mxu0 %v51_v4  ;;  %v46_v9 = vpack.c.bf16 %v45_v8, %v44_v7  ;;  %v126_v10 = vld [vmem:[%s295_s2] ss:$0 sm:$0xff]  ;;  %s190_s13 = scalar_lea.vmem %s114_s12, 256  ;;  %p195_p3 = scmp.lt.s32.totalorder %s114_s12, %s114_s12 }
  0x2a   :  { %133 = vmatprep.subr.bf16.mxu0 %v222_v0  ;;  %p191_p2 = scmp.ne.s32.totalorder %s114_s12, %s190_s13  ;;  %p196_p4 = scmp.lt.s32.totalorder %s190_s13, %s190_s13 }
  0x2c   :  { %p197_p5 = por %p196_p4, %p195_p3 }
  0x2d   :  { %134 = vmatpush3.bf16.msra.mxu0 %v52_v6 }
  0x2e   :  { %p198_p6 = pnand %p197_p5, %p191_p2 }
  0x30   :  { %136 = vmatmul.mubr.msk.bf16.vlgmr.msra.gmra.mrb[0].mxu0 %vm60_vm1, %v46_v9 }
 0x103   :  { %v98_v11 = vpop.f32.mrb[0].mxu0 }
 0x104   :  { %v99_v12 = vadd.f32 %v126_v10, %v98_v11  ;;  %v137_v13 = vpop.f32.mrb[1].mxu0 }
 0x105   :  { %v101_v14 = vpop.f32.mrb[2].mxu0 }
 0x106   :  { %v102_v15 = vadd.f32 %v126_v10, %v101_v14  ;;  %v138_v16 = vpop.f32.mrb[3].mxu0  ;;  %106 = vst.msk [vmem:[#allocation7] sm:$0xff] %vm105_vm2, %v99_v12 }
 0x108   :  { %107 = vst.msk [vmem:[#allocation7 + $0x8] sm:$0xff] %vm105_vm2, %v102_v15 }
 0x109   :  { %201 = shalt.err (!%p198_p6)
}
 0x10a   :  { %s202_s15 = scalar_lea.hbm %s296_s3, 256 }
 0x10b   :  { %p203_p7 = scmp.ne.s32.totalorder %s296_s3, %s202_s15  ;;  %p206_p8 = scmp.lt.u32.totalorder %s202_s15, %s296_s3 }
 0x10d   :  { %p208_p9 = pnand %p206_p8, %p203_p7 }
 0x10f   :  { %211 = shalt.err (!%p208_p9)
}
 0x110   :  { %119 = dma.vmem_to_hbm [thread:$0]  %s114_s12, 256, %s296_s3, [#allocation4], %s219_s22, %s219_s22, %s220_s23  }
 0x111   :  { %216 = dma.done.wait [#allocation4], 256  }
 0x112   :  { %217 = vsyncadd [#allocation4], 4294967040 }
 0x113   :  { %123 = vsyncpa [#allocation3], 1 }
 0x114   :  { %124 = vsyncpa [#allocation6], 1 }
 0x115   :  { %125 = vsyncpa [#allocation4], 1 }

</bundles_post_ra>
